<compile_context>
chip_gen: v6e
topology: v6e:2x2x1
jax: 0.10.0
libtpu: 0.0.40
codegen_flags: <defaults>
</compile_context>

<pallas_src>
import functools

import jax
import jax.numpy as jnp
from jax.experimental import pallas as pl
from jax.experimental.pallas import tpu as pltpu

EPS = 1e-6  # torch F.pairwise_distance default eps


def _round_up(x, m):
    return (x + m - 1) // m * m


def _vmem_capacity_bytes():
    """Per-TensorCore VMEM capacity; conservative (v7x = 64 MiB) if unknown."""
    try:
        cap = getattr(pltpu.get_tpu_info(), "vmem_capacity_bytes", None)
        if cap:
            return int(cap)
    except Exception:
        pass
    return 64 * 1024 * 1024


def _pick_tiles(B, D, itemsize, step_budget, sublane_mult):
    """Pick (tb, td) against the true per-step live footprint.

    Per grid step the live VMEM is roughly:
      inputs (2 arrays x 2 pipeline buffers):   4 * tb*td*itemsize
      f32 upcasts + diff/sq temporaries:       ~12 * tb*td
      lane-padded label tiles + sqsum scratch: ~1536 * tb
    """
    per_elem = 4 * itemsize + 12
    per_row_fixed = 1536

    def rows_that_fit(td_):
        r = step_budget // (td_ * per_elem + per_row_fixed)
        return (r // sublane_mult) * sublane_mult

    b_full = _round_up(max(B, 1), sublane_mult)
    tb = rows_that_fit(D)
    if tb >= sublane_mult:
        td = D
        tb = min(tb, b_full)
        # Keep >= 2 batch blocks when possible so both v7x TensorCores stream
        # half the batch; the extra grid step is noise (~0.35us) on 1-core parts.
        if b_full >= 2 * sublane_mult:
            tb = min(tb, _round_up(pl.cdiv(b_full, 2), sublane_mult))
    else:
        # Embedding too wide for even a minimal batch tile: split the feature dim.
        tb = sublane_mult
        td = (step_budget - tb * per_row_fixed) // (tb * per_elem)
        td = max(128, (td // 128) * 128)
        td = min(td, _round_up(D, 128))
    return tb, td


def _contrastive_loss_kernel(x1_ref, x2_ref, label_ref, out_ref, sqsum_ref, *,
                             margin, true_b, true_d, tb, td, mask_rows, mask_cols):
    i = pl.program_id(0)   # batch block ("parallel")
    j = pl.program_id(1)   # feature block (reduction axis, innermost, "arbitrary")

    @pl.when(j == 0)
    def _init():
        sqsum_ref[...] = jnp.zeros_like(sqsum_ref)

    x1 = x1_ref[...].astype(jnp.float32)          # (tb, td)
    x2 = x2_ref[...].astype(jnp.float32)
    diff = x1 - x2 + EPS                          # torch adds eps before the norm
    sq = diff * diff
    if mask_cols:                                 # ragged last feature block
        col = jax.lax.broadcasted_iota(jnp.int32, (tb, td), 1) + j * td
        sq = jnp.where(col < true_d, sq, 0.0)
    sqsum_ref[...] += jnp.sum(sq, axis=-1, keepdims=True)   # (tb, 1)

    @pl.when(j == pl.num_programs(1) - 1)
    def _finalize():
        label = label_ref[...].astype(jnp.float32)           # (tb, 1)
        sq_sum = sqsum_ref[...]                              # == d^2 (skip sqrt->square round trip)
        d = jnp.sqrt(sq_sum)
        hinge = jnp.maximum(margin - d, 0.0)
        per_example = (1.0 - label) * sq_sum + label * (hinge * hinge)
        if mask_rows:                                        # ragged last batch block
            row = jax.lax.broadcasted_iota(jnp.int32, (tb, 1), 0) + i * tb
            per_example = jnp.where(row < true_b, per_example, 0.0)
        partial = jnp.sum(per_example)
        # Lane-dense full-tile (unmasked) store of this block's partial sum.
        out_ref[...] = jnp.full(out_ref.shape, partial, dtype=out_ref.dtype)


def contrastive_loss(output1, output2, label, *, margin=2.0, b_tile=None, d_tile=None):
    """output1, output2: (B, D); label: (B,) or (B, 1). Returns scalar mean loss."""
    B, D = output1.shape
    itemsize = jnp.dtype(output1.dtype).itemsize
    sublane_mult = max(8, 32 // itemsize)   # 8 f32, 16 bf16, 32 int8/fp8

    vmem_cap = _vmem_capacity_bytes()
    vmem_limit = (3 * vmem_cap) // 4                        # 48 MiB v7x, 96 MiB v5e/v6e
    step_budget = max(vmem_cap // 2 - (4 << 20), 8 << 20)   # 28 MiB v7x, 60 MiB v5e/v6e

    tb, td = _pick_tiles(B, D, itemsize, step_budget, sublane_mult)
    if b_tile is not None:          # test override
        tb = int(b_tile)
    if d_tile is not None:          # test override (multiple of 128, or == D)
        td = min(int(d_tile), D)

    g_b = pl.cdiv(B, tb)
    g_d = pl.cdiv(D, td)
    mask_rows = (g_b * tb != B)
    mask_cols = (g_d * td != D)

    label2d = jnp.reshape(label, (B, 1)).astype(jnp.float32)

    kernel = functools.partial(
        _contrastive_loss_kernel,
        margin=float(margin), true_b=B, true_d=D, tb=tb, td=td,
        mask_rows=mask_rows, mask_cols=mask_cols,
    )

    partials = pl.pallas_call(
        kernel,
        out_shape=jax.ShapeDtypeStruct((g_b, 8, 128), jnp.float32),
        grid_spec=pltpu.PrefetchScalarGridSpec(
            num_scalar_prefetch=0,
            grid=(g_b, g_d),
            in_specs=[
                pl.BlockSpec((tb, td), lambda i, j: (i, j)),
                pl.BlockSpec((tb, td), lambda i, j: (i, j)),
                pl.BlockSpec((tb, 1), lambda i, j: (i, 0)),
            ],
            out_specs=pl.BlockSpec((1, 8, 128), lambda i, j: (i, 0, 0)),
            scratch_shapes=[pltpu.VMEM((tb, 1), jnp.float32)],
        ),
        compiler_params=pltpu.CompilerParams(
            dimension_semantics=("parallel", "arbitrary"),
            vmem_limit_bytes=vmem_limit,
        ),
        cost_estimate=pl.CostEstimate(
            flops=4 * B * D + 8 * B,
            transcendentals=B,
            bytes_accessed=2 * B * D * itemsize + 4 * B + g_b * 8 * 128 * 4,
        ),
    )(output1, output2, label2d)

    # Each (8,128) block holds its partial sum replicated 1024x: reduce the whole
    # contiguous lane-dense slab, fold the replication factor and /B into one divide.
    return jnp.sum(partials) / (jnp.float32(B) * 1024.0)


def contrastive_loss_ref(output1, output2, label, *, margin=2.0):
    # Pure-JAX reference mirroring torch exactly (sqrt then pow(., 2)).
    x1 = output1.astype(jnp.float32)
    x2 = output2.astype(jnp.float32)
    lbl = label.astype(jnp.float32)
    d = jnp.sqrt(jnp.sum((x1 - x2 + EPS) ** 2, axis=-1))
    return jnp.mean((1.0 - lbl) * d ** 2 + lbl * jnp.maximum(margin - d, 0.0) ** 2)


def _check(loss, ref):
    assert jnp.allclose(loss, ref, rtol=1e-5, atol=1e-5), (loss, ref)


if __name__ == "__main__":
    key = jax.random.PRNGKey(0)
    k1, k2, k3 = jax.random.split(key, 3)

    # 1) Basic f32 case.
    B, D = 8, 32
    o1 = jax.random.normal(k1, (B, D), dtype=jnp.float32)
    o2 = jax.random.normal(k2, (B, D), dtype=jnp.float32)
    lb = jax.random.bernoulli(k3, 0.5, (B,)).astype(jnp.float32)
    loss = contrastive_loss(o1, o2, lb)
    jax.block_until_ready(loss)
    _check(loss, contrastive_loss_ref(o1, o2, lb))

    # 2) Ragged batch (B not a multiple of the tile; no host-side padding).
    B2 = 13
    o1 = jax.random.normal(k1, (B2, D), dtype=jnp.float32)
    o2 = jax.random.normal(k2, (B2, D), dtype=jnp.float32)
    lb = jax.random.bernoulli(k3, 0.5, (B2,)).astype(jnp.float32)
    loss2 = contrastive_loss(o1, o2, lb)
    jax.block_until_ready(loss2)
    _check(loss2, contrastive_loss_ref(o1, o2, lb))

    # 3) Feature-split path (2 feature blocks, scratch accumulator + pl.when finalize).
    B3, D3 = 16, 256
    o1 = jax.random.normal(k1, (B3, D3), dtype=jnp.float32)
    o2 = jax.random.normal(k2, (B3, D3), dtype=jnp.float32)
    lb = jax.random.bernoulli(k3, 0.5, (B3,)).astype(jnp.float32)
    loss3 = contrastive_loss(o1, o2, lb, d_tile=128)
    jax.block_until_ready(loss3)
    _check(loss3, contrastive_loss_ref(o1, o2, lb))

    # 4) Ragged in both batch and feature dims (both iota masks exercised).
    B4, D4 = 13, 200
    o1 = jax.random.normal(k1, (B4, D4), dtype=jnp.float32)
    o2 = jax.random.normal(k2, (B4, D4), dtype=jnp.float32)
    lb = jax.random.bernoulli(k3, 0.5, (B4,)).astype(jnp.float32)
    loss4 = contrastive_loss(o1, o2, lb, b_tile=8, d_tile=128)
    jax.block_until_ready(loss4)
    _check(loss4, contrastive_loss_ref(o1, o2, lb))

    # 5) bf16 embeddings (in-kernel upcast, sublane multiple 16).
    B5, D5 = 16, 64
    o1 = jax.random.normal(k1, (B5, D5), dtype=jnp.bfloat16)
    o2 = jax.random.normal(k2, (B5, D5), dtype=jnp.bfloat16)
    lb = jax.random.bernoulli(k3, 0.5, (B5,)).astype(jnp.float32)
    loss5 = contrastive_loss(o1, o2, lb)
    jax.block_until_ready(loss5)
    _check(loss5, contrastive_loss_ref(o1, o2, lb))

    print("KERNEL_OK")
</pallas_src>

<mosaic_0001>
module attributes {stable_mosaic.version = 11 : i64} {
  func.func @_contrastive_loss_kernel(%arg0: i32, %arg1: i32, %arg2: memref<8x32xf32, #tpu.memory_space<vmem>>, %arg3: memref<8x32xf32, #tpu.memory_space<vmem>>, %arg4: memref<8x1xf32, #tpu.memory_space<vmem>>, %arg5: memref<1x8x128xf32, #tpu.memory_space<vmem>>, %arg6: memref<8x1xf32, #tpu.memory_space<vmem>>) attributes {dimension_semantics = [#tpu.dimension_semantics<parallel>, #tpu.dimension_semantics<arbitrary>], iteration_bounds = array<i64: 1, 1>, scalar_prefetch = 0 : i64, scratch_operands = 1 : i64, tpu.core_type = #tpu.core_type<tc>, window_params = [{transform_indices = @transform_0, window_bounds = array<i64: 8, 32>}, {transform_indices = @transform_1, window_bounds = array<i64: 8, 32>}, {transform_indices = @transform_2, window_bounds = array<i64: 8, 1>}, {transform_indices = @transform_3, window_bounds = array<i64: 1, 8, 128>}]} {
    %c0_i32 = arith.constant 0 : i32
    %0 = arith.cmpi eq, %arg1, %c0_i32 : i32
    %1 = arith.extui %0 : i1 to i32
    %c0_i32_0 = arith.constant 0 : i32
    %2 = arith.cmpi ne, %1, %c0_i32_0 : i32
    scf.if %2 {
      %cst_11 = arith.constant 0.000000e+00 : f32
      %17 = vector.broadcast %cst_11 : f32 to vector<8x1xf32>
      %c0_12 = arith.constant 0 : index
      %c0_13 = arith.constant 0 : index
      %18 = vector.load %arg6[%c0_12, %c0_13] : memref<8x1xf32, #tpu.memory_space<vmem>>, vector<8x1xf32>
      tpu.vector_store %arg6[%c0_12, %c0_13], %17 {strides = array<i32>} : memref<8x1xf32, #tpu.memory_space<vmem>>, vector<8x1xf32>,
    } else {
    }
    %c0 = arith.constant 0 : index
    %c0_1 = arith.constant 0 : index
    %3 = vector.load %arg2[%c0, %c0_1] : memref<8x32xf32, #tpu.memory_space<vmem>>, vector<8x32xf32>
    %c0_2 = arith.constant 0 : index
    %c0_3 = arith.constant 0 : index
    %4 = vector.load %arg3[%c0_2, %c0_3] : memref<8x32xf32, #tpu.memory_space<vmem>>, vector<8x32xf32>
    %5 = arith.subf %3, %4 : vector<8x32xf32>
    %cst = arith.constant 9.99999997E-7 : f32
    %6 = vector.broadcast %cst : f32 to vector<8x32xf32>
    %7 = arith.addf %5, %6 : vector<8x32xf32>
    %8 = arith.mulf %7, %7 : vector<8x32xf32>
    %c0_4 = arith.constant 0 : index
    %c0_5 = arith.constant 0 : index
    %9 = vector.load %arg6[%c0_4, %c0_5] : memref<8x1xf32, #tpu.memory_space<vmem>>, vector<8x1xf32>
    %cst_6 = arith.constant dense<0.000000e+00> : vector<8xf32>
    %10 = vector.multi_reduction <add>, %8, %cst_6 [1] : vector<8x32xf32> to vector<8xf32>
    %11 = vector.shape_cast %10 : vector<8xf32> to vector<8x1xf32>
    %12 = arith.addf %9, %11 : vector<8x1xf32>
    %c0_7 = arith.constant 0 : index
    %c0_8 = arith.constant 0 : index
    %13 = vector.load %arg6[%c0_7, %c0_8] : memref<8x1xf32, #tpu.memory_space<vmem>>, vector<8x1xf32>
    tpu.vector_store %arg6[%c0_7, %c0_8], %12 {strides = array<i32>} : memref<8x1xf32, #tpu.memory_space<vmem>>, vector<8x1xf32>,
    %c0_i32_9 = arith.constant 0 : i32
    %14 = arith.cmpi eq, %arg1, %c0_i32_9 : i32
    %15 = arith.extui %14 : i1 to i32
    %c0_i32_10 = arith.constant 0 : i32
    %16 = arith.cmpi ne, %15, %c0_i32_10 : i32
    scf.if %16 {
      %c0_11 = arith.constant 0 : index
      %c0_12 = arith.constant 0 : index
      %17 = vector.load %arg4[%c0_11, %c0_12] : memref<8x1xf32, #tpu.memory_space<vmem>>, vector<8x1xf32>
      %c0_13 = arith.constant 0 : index
      %c0_14 = arith.constant 0 : index
      %18 = vector.load %arg6[%c0_13, %c0_14] : memref<8x1xf32, #tpu.memory_space<vmem>>, vector<8x1xf32>
      %19 = math.sqrt %18 : vector<8x1xf32>
      %cst_15 = arith.constant 2.000000e+00 : f32
      %20 = vector.broadcast %cst_15 : f32 to vector<8x1xf32>
      %21 = arith.subf %20, %19 : vector<8x1xf32>
      %cst_16 = arith.constant 0.000000e+00 : f32
      %22 = vector.broadcast %cst_16 : f32 to vector<8x1xf32>
      %23 = arith.maximumf %21, %22 : vector<8x1xf32>
      %cst_17 = arith.constant 1.000000e+00 : f32
      %24 = vector.broadcast %cst_17 : f32 to vector<8x1xf32>
      %25 = arith.subf %24, %17 : vector<8x1xf32>
      %26 = arith.mulf %25, %18 : vector<8x1xf32>
      %27 = arith.mulf %23, %23 : vector<8x1xf32>
      %28 = arith.mulf %17, %27 : vector<8x1xf32>
      %29 = arith.addf %26, %28 : vector<8x1xf32>
      %30 = vector.shape_cast %29 : vector<8x1xf32> to vector<1x8x1xf32>
      %cst_18 = arith.constant dense<0.000000e+00> : vector<1xf32>
      %31 = vector.multi_reduction <add>, %30, %cst_18 [1, 2] : vector<1x8x1xf32> to vector<1xf32>
      %32 = vector.shape_cast %31 : vector<1xf32> to vector<1x1x1xf32>
      %33 = vector.extract %32[0, 0, 0] : f32 from vector<1x1x1xf32>
      %34 = vector.broadcast %33 : f32 to vector<1x8x128xf32>
      %c0_19 = arith.constant 0 : index
      %c0_20 = arith.constant 0 : index
      %c0_21 = arith.constant 0 : index
      %35 = vector.load %arg5[%c0_19, %c0_20, %c0_21] : memref<1x8x128xf32, #tpu.memory_space<vmem>>, vector<1x8x128xf32>
      tpu.vector_store %arg5[%c0_19, %c0_20, %c0_21], %34 {strides = array<i32>} : memref<1x8x128xf32, #tpu.memory_space<vmem>>, vector<1x8x128xf32>,
    } else {
    }
    return
  }
  func.func @transform_0(%arg0: i32, %arg1: i32) -> (i32, i32) {
    %c0_i32 = arith.constant 0 : i32
    return %arg0, %arg1 : i32, i32
  }
  func.func @transform_1(%arg0: i32, %arg1: i32) -> (i32, i32) {
    %c0_i32 = arith.constant 0 : i32
    return %arg0, %arg1 : i32, i32
  }
  func.func @transform_2(%arg0: i32, %arg1: i32) -> (i32, i32) {
    %c0_i32 = arith.constant 0 : i32
    %c0_i32_0 = arith.constant 0 : i32
    return %arg0, %c0_i32 : i32, i32
  }
  func.func @transform_3(%arg0: i32, %arg1: i32) -> (i32, i32, i32) {
    %c0_i32 = arith.constant 0 : i32
    %c0_i32_0 = arith.constant 0 : i32
    %c0_i32_1 = arith.constant 0 : i32
    return %arg0, %c0_i32, %c0_i32_0 : i32, i32, i32
  }
}

</mosaic_0001>

<bundles_post_ra>
// kernel: tpu_custom_call.1
= control target key start
LH: loop header
LB: loop body
LE: loop exit
PB: predicated region body
PF: predicated region fallthrough
CT: control target
= control target key end

     0   :  { %8 = vsyncpa [#allocation4], 0  ;;  %s181_s0 = inlined_call_operand.vmem [shape: f32[8,32], index: 0, kind: input, shape index: {}]   ;;  %s182_s1 = inlined_call_operand.hbm [shape: f32[8,32], index: 1, kind: input, shape index: {}]   ;;  %s183_s2 = inlined_call_operand.vmem [shape: f32[8,1], index: 2, kind: input, shape index: {}]   ;;  %s184_s3 = inlined_call_operand.hbm [shape: f32[1,8,128], index: 3, kind: output, shape index: {}]  }
   0x1   :  { %9 = vsyncpa [#allocation5], 0  ;;  %s143_s12 = smov [#allocation3]  }
   0x2   :  { %s18_s13 = sshll.u32 %s143_s12, 4  ;;  %s19_s13 = int_to_ptr.vmem [resolvable:$true] %s18_s13 }
   0x3   :  { %s107_s14 = scalar_lea.vmem %s19_s13, 128  ;;  %p112_p1 = scmp.lt.s32.totalorder %s19_s13, %s19_s13 }
   0x4   :  { %p108_p0 = scmp.ne.s32.totalorder %s19_s13, %s107_s14  ;;  %p113_p2 = scmp.lt.s32.totalorder %s107_s14, %s107_s14 }
   0x6   :  { %p114_p3 = por %p113_p2, %p112_p1 }
   0x8   :  { %p115_p4 = pnand %p114_p3, %p108_p0 }
   0xa   :  { %118 = shalt.err (!%p115_p4)
}
   0xb   :  { %21 = dma.hbm_to_vmem [thread:$0]  %s182_s1, 128, %s19_s13, [#allocation4]  }
   0xc   :  { %139 = dma.done.wait [#allocation4], 128  }
   0xd   :  { %140 = vsyncadd [#allocation4], 4294967168  ;;  %vm31_vm0 = vcmask 7168   ;;  %v144_v0 = vmov 0.0   ;;  %v33_v1 = vld [vmem:[%s181_s0] sm:$0xff]  ;;  %v34_v2 = vld [vmem:[#allocation3] sm:$0xff] }
   0xe   :  { %32 = vst.msk [vmem:[#allocation2] sm:$0xff] %vm31_vm0, %v144_v0  ;;  %v35_v3 = vsub.f32 %v33_v1, %v34_v2  ;;  %vm39_vm1 = vcmask 261120   ;;  %v49_v15 = vld [vmem:[%s183_s2] sm:$0xff]  ;;  %s145_s2 = smov [#allocation6]  }
   0xf   :  { %v60_v19 = vsub.f32 1.0, %v49_v15  ;;  %s83_s19 = sshll.u32 %s145_s2, 4  ;;  %s84_s19 = int_to_ptr.vmem [resolvable:$true] %s83_s19 }
  0x10   :  { %v36_v4 = vadd.f32 1e-06, %v35_v3  ;;  %s119_s21 = scalar_lea.vmem %s84_s19, 128  ;;  %p124_p6 = scmp.lt.s32.totalorder %s84_s19, %s84_s19 }
  0x11   :  { %p120_p5 = scmp.ne.s32.totalorder %s84_s19, %s119_s21  ;;  %p125_p7 = scmp.lt.s32.totalorder %s119_s21, %s119_s21 }
  0x12   :  { %v37_v5 = vmul.f32 %v36_v4, %v36_v4 }
  0x13   :  { %p126_p8 = por %p125_p7, %p124_p6 }
  0x14   :  { %v40_v6 = vsel %vm39_vm1, %v37_v5, 0.0 }
  0x15   :  { %41 = vadd.xlane.f32.xlu0 %v40_v6  ;;  %v38_v7 = vld [vmem:[#allocation2] sm:$0xff]  ;;  %p127_p9 = pnand %p126_p8, %p120_p5 }
  0x9e   :  { %v42_v8 = vpop.xlane.xlu0 %41 }
  0x9f   :  { %v43_v9 = vadd.f32 %v42_v8, %v38_v7 }
  0xa1   :  { %45 = vst.msk [vmem:[#allocation2] sm:$0xff] %vm31_vm0, %v43_v9 }
  0xa8   :  { %v50_v10 = vld [vmem:[#allocation2] sm:$0xff] }
  0xa9   :  { %97 = vrsqrt.f32 %v50_v10  ;;  %vm53_vm2 = vcmp.eq.f32.partialorder %v50_v10, inf  ;;  %v56_v13 = vand.u32 2147483648, %v50_v10  ;;  %vm55_vm3 = vcmp.eq.f32.partialorder %v50_v10, 0.0 }
  0xaa   :  { %v61_v21 = vmul.f32 %v60_v19, %v50_v10 }
  0xb6   :  { %v98_v11 = vpop.eup %97 }
  0xb7   :  { %v52_v12 = vmul.f32 %v98_v11, %v50_v10 }
  0xb9   :  { %v54_v14 = vsel %vm53_vm2, %v50_v10, %v52_v12 }
  0xba   :  { %v57_v16 = vsel %vm55_vm3, %v56_v13, %v54_v14 }
  0xbb   :  { %v58_v17 = vsub.f32 2.0, %v57_v16 }
  0xbd   :  { %v59_v18 = vmax.f32 %v58_v17, 0.0 }
  0xbf   :  { %v62_v20 = vmul.f32 %v59_v18, %v59_v18 }
  0xc1   :  { %v63_v22 = vmul.f32 %v62_v20, %v49_v15 }
  0xc3   :  { %v64_v23 = vadd.f32 %v63_v22, %v61_v21 }
  0xc5   :  { %v65_v24 = vsel %vm31_vm0, %v64_v23, 0.0 }
  0xc6   :  { %66 = vadd.xlane.f32.xlu0 %v65_v24 }
 0x14f   :  { %v67_v25 = vpop.xlane.xlu0 %66 }
 0x150   :  { %v68_v26 = vrot.slane %v67_v25, 4 }
 0x152   :  { %v69_v27 = vadd.f32 %v68_v26, %v67_v25 }
 0x154   :  { %v70_v28 = vrot.slane %v69_v27, 2 }
 0x156   :  { %v71_v29 = vadd.f32 %v70_v28, %v69_v27 }
 0x158   :  { %v72_v30 = vrot.slane %v71_v29, 1 }
 0x15a   :  { %v73_v31 = vadd.f32 %v72_v30, %v71_v29 }
 0x15c   :  { %92 = vpush %v73_v31 }
 0x18d   :  { %s93_s20 = spop %92 }
 0x18e   :  { %v75_v32 = vstv %s93_s20 }
 0x18f   :  { %76 = vst [vmem:[#allocation6] sm:$0xff] %v75_v32 }
 0x190   :  { %130 = shalt.err (!%p127_p9)
}
 0x191   :  { %86 = dma.vmem_to_hbm [thread:$0]  %s84_s19, 128, %s184_s3, [#allocation5]  }
 0x192   :  { %141 = dma.done.wait [#allocation5], 128  }
 0x193   :  { %142 = vsyncadd [#allocation5], 4294967168 }
 0x194   :  { %90 = vsyncpa [#allocation4], 1 }
 0x195   :  { %91 = vsyncpa [#allocation5], 1 }

</bundles_post_ra>
